<compile_context>
chip_gen: v7x
topology: tpu7x:2x2x1
jax: 0.10.0
libtpu: 0.0.40
codegen_flags: <defaults>
</compile_context>

<pallas_src>
import jax
import jax.numpy as jnp
from jax.experimental import pallas as pl
from jax.experimental.pallas import tpu as pltpu

# ---- model sizes (small, consistent with the module's forward) ----
LATENT  = 8     # y.shape[1]; only columns 0:2 are used by the forward
HID     = 32    # MLP hidden width
OUT_DIM = 2     # net[0] output size (one complex eigenpair -> 2 values)
TB      = 128   # batch rows per grid step
BATCH   = 256   # demo batch size

# packed weight slab layout (rows x 128 lanes, f32, zero-padded):
#   rows 0:8    : row 0 = W1 (1 x HID), row 1 = b1, row 2 = b2, row 3 = b3
#   rows 8:136  : W2 padded to (128, 128)   (real data in [0:HID, 0:HID])
#   rows 136:264: W3 padded to (128, 128)   (real data in [0:HID, 0:OUT_DIM])
_W2_ROW   = 8
_W3_ROW   = 8 + 128
SLAB_ROWS = 8 + 128 + 128            # 264 rows -> 132 KiB, every block 8-row aligned


def _states_aux_kernel(w_ref, y_ref, o_ref):
    f32 = jnp.float32
    y = y_ref[...]                                        # (TB, LATENT)

    # yradius = || y[:, 0:2] ||_2  (per row)
    y0 = y[:, 0:1]
    y1 = y[:, 1:2]
    r = jnp.sqrt(y0 * y0 + y1 * y1)                       # (TB, 1)

    # weights: aligned static slices of the VMEM-resident slab
    w1 = w_ref[0:1, :]                                    # (1, 128)  W1 row
    b1 = w_ref[1:2, :]                                    # (1, 128)
    b2 = w_ref[2:3, :]                                    # (1, 128)
    b3 = w_ref[3:4, :]                                    # (1, 128)
    W2 = w_ref[_W2_ROW:_W2_ROW + 128, :]                  # (128, 128), zero-padded
    W3 = w_ref[_W3_ROW:_W3_ROW + 128, :]                  # (128, 128), zero-padded

    # layer 1 (input 1 -> HID): outer product == broadcast multiply on the VPU
    h1 = jnp.tanh(r * w1 + b1)                            # (TB, 128); cols >= HID stay 0
    # layer 2 (HID -> HID) on the MXU
    h2 = jnp.tanh(jnp.dot(h1, W2, preferred_element_type=f32) + b2)
    # output layer (HID -> OUT_DIM) on the MXU
    lam = jnp.dot(h2, W3, preferred_element_type=f32) + b3

    o_ref[...] = lam[:, 0:OUT_DIM]                        # (TB, OUT_DIM)


def states_auxiliary_forward(y, packed_w):
    """States_Auxiliary.forward: y (B, LATENT) -> Lambdas (B, OUT_DIM)."""
    B = y.shape[0]
    Bp = ((B + TB - 1) // TB) * TB
    if Bp != B:                                           # pad batch to a tile multiple
        y = jnp.pad(y, ((0, Bp - B), (0, 0)))
    grid = (pl.cdiv(Bp, TB),)

    out = pl.pallas_call(
        _states_aux_kernel,
        out_shape=jax.ShapeDtypeStruct((Bp, OUT_DIM), jnp.float32),
        grid_spec=pltpu.PrefetchScalarGridSpec(
            num_scalar_prefetch=0,
            grid=grid,
            in_specs=[
                # weight slab: same block index every grid step -> fetched once,
                # stays resident in VMEM for the whole grid
                pl.BlockSpec((SLAB_ROWS, 128), lambda i: (0, 0)),
                # y tiles stream in along the batch axis
                pl.BlockSpec((TB, LATENT), lambda i: (i, 0)),
            ],
            out_specs=pl.BlockSpec((TB, OUT_DIM), lambda i: (i, 0)),
        ),
        compiler_params=pltpu.CompilerParams(
            dimension_semantics=("parallel",)),
    )(packed_w, y)
    return out[:B] if Bp != B else out


# ---------------- deterministic parameter init + host-side packing ----------------
def _linear(key, fan_in, fan_out):
    k1, k2 = jax.random.split(key)
    bound = 1.0 / jnp.sqrt(jnp.float32(fan_in))
    W = jax.random.uniform(k1, (fan_in, fan_out), jnp.float32, -bound, bound)
    b = jax.random.uniform(k2, (fan_out,), jnp.float32, -bound, bound)
    return W, b


def init_params(key):
    k1, k2, k3 = jax.random.split(key, 3)
    W1, b1 = _linear(k1, 1,   HID)        # input layer  (input_size = 1)
    W2, b2 = _linear(k2, HID, HID)        # hidden layer (num_layers = 2)
    W3, b3 = _linear(k3, HID, OUT_DIM)    # output layer (output_size = 2)
    return [W1, b1, W2, b2, W3, b3]


def pack_params(params):
    """Pack all parameters into one (8,128)-tile-aligned, zero-padded f32 slab."""
    W1, b1, W2, b2, W3, b3 = params
    slab = jnp.zeros((SLAB_ROWS, 128), jnp.float32)
    slab = slab.at[0, :HID].set(W1[0])
    slab = slab.at[1, :HID].set(b1)
    slab = slab.at[2, :HID].set(b2)
    slab = slab.at[3, :OUT_DIM].set(b3)
    slab = slab.at[_W2_ROW:_W2_ROW + HID, :HID].set(W2)
    slab = slab.at[_W3_ROW:_W3_ROW + HID, :OUT_DIM].set(W3)
    return slab


# ---------------- pure-JAX reference (correctness check only) ----------------
def _reference(y, params):
    W1, b1, W2, b2, W3, b3 = params
    hi = jax.lax.Precision.HIGHEST
    yblock = y[:, 0:2]
    r = jnp.sqrt(jnp.sum(yblock * yblock, axis=1, keepdims=True))   # (B, 1)
    h1 = jnp.tanh(jnp.dot(r, W1, precision=hi) + b1)
    h2 = jnp.tanh(jnp.dot(h1, W2, precision=hi) + b2)
    return jnp.dot(h2, W3, precision=hi) + b3                       # (B, OUT_DIM)


if __name__ == "__main__":
    key = jax.random.PRNGKey(0)
    ky, kp = jax.random.split(key)
    y = jax.random.normal(ky, (BATCH, LATENT), jnp.float32)
    params = init_params(kp)
    slab = pack_params(params)

    out = states_auxiliary_forward(y, slab)
    out = jax.block_until_ready(out)

    ref = _reference(y, params)
    assert out.shape == ref.shape == (BATCH, OUT_DIM), (out.shape, ref.shape)
    assert jnp.allclose(out, ref, rtol=1e-3, atol=1e-4), (out, ref)

    print("KERNEL_OK")
</pallas_src>

<mosaic_0001>
module attributes {stable_mosaic.version = 11 : i64} {
  func.func @_states_aux_kernel(%arg0: i32, %arg1: memref<264x128xf32, #tpu.memory_space<vmem>>, %arg2: memref<128x8xf32, #tpu.memory_space<vmem>>, %arg3: memref<128x2xf32, #tpu.memory_space<vmem>>) attributes {dimension_semantics = [#tpu.dimension_semantics<parallel>], iteration_bounds = array<i64: 2>, scalar_prefetch = 0 : i64, scratch_operands = 0 : i64, tpu.core_type = #tpu.core_type<tc>, window_params = [{pipeline_mode = #tpu.pipeline_mode<synchronous>, transform_indices = @transform_0, window_bounds = array<i64: 264, 128>}, {transform_indices = @transform_1, window_bounds = array<i64: 128, 8>}, {transform_indices = @transform_2, window_bounds = array<i64: 128, 2>}]} {
    %c0 = arith.constant 0 : index
    %c0_0 = arith.constant 0 : index
    %0 = vector.load %arg2[%c0, %c0_0] : memref<128x8xf32, #tpu.memory_space<vmem>>, vector<128x8xf32>
    %1 = vector.extract_strided_slice %0 {offsets = [0, 0], sizes = [128, 1], strides = [1, 1]} : vector<128x8xf32> to vector<128x1xf32>
    %2 = vector.extract_strided_slice %0 {offsets = [0, 1], sizes = [128, 1], strides = [1, 1]} : vector<128x8xf32> to vector<128x1xf32>
    %3 = arith.mulf %1, %1 : vector<128x1xf32>
    %4 = arith.mulf %2, %2 : vector<128x1xf32>
    %5 = arith.addf %3, %4 : vector<128x1xf32>
    %6 = math.sqrt %5 : vector<128x1xf32>
    %c0_1 = arith.constant 0 : index
    %c0_2 = arith.constant 0 : index
    %7 = vector.load %arg1[%c0_1, %c0_2] : memref<264x128xf32, #tpu.memory_space<vmem>>, vector<1x128xf32>
    %c1 = arith.constant 1 : index
    %c0_3 = arith.constant 0 : index
    %8 = vector.load %arg1[%c1, %c0_3] : memref<264x128xf32, #tpu.memory_space<vmem>>, vector<1x128xf32>
    %c2 = arith.constant 2 : index
    %c0_4 = arith.constant 0 : index
    %9 = vector.load %arg1[%c2, %c0_4] : memref<264x128xf32, #tpu.memory_space<vmem>>, vector<1x128xf32>
    %c3 = arith.constant 3 : index
    %c0_5 = arith.constant 0 : index
    %10 = vector.load %arg1[%c3, %c0_5] : memref<264x128xf32, #tpu.memory_space<vmem>>, vector<1x128xf32>
    %c8 = arith.constant 8 : index
    %c0_6 = arith.constant 0 : index
    %11 = vector.load %arg1[%c8, %c0_6] : memref<264x128xf32, #tpu.memory_space<vmem>>, vector<128x128xf32>
    %c136 = arith.constant 136 : index
    %c0_7 = arith.constant 0 : index
    %12 = vector.load %arg1[%c136, %c0_7] : memref<264x128xf32, #tpu.memory_space<vmem>>, vector<128x128xf32>
    %13 = vector.broadcast %6 : vector<128x1xf32> to vector<128x128xf32>
    %14 = vector.broadcast %7 : vector<1x128xf32> to vector<128x128xf32>
    %15 = arith.mulf %13, %14 : vector<128x128xf32>
    %16 = vector.broadcast %8 : vector<1x128xf32> to vector<128x128xf32>
    %17 = arith.addf %15, %16 : vector<128x128xf32>
    %18 = math.tanh %17 : vector<128x128xf32>
    %cst = arith.constant dense<0.000000e+00> : vector<128x128xf32>
    %19 = tpu.matmul %18, %11, %cst {dimension_numbers = #tpu.dot_dimension_numbers<[1], [0], [0], [1], [0, 0, 1, 1], [], []>} : vector<128x128xf32>, vector<128x128xf32>, vector<128x128xf32> -> vector<128x128xf32>
    %20 = vector.broadcast %9 : vector<1x128xf32> to vector<128x128xf32>
    %21 = arith.addf %19, %20 : vector<128x128xf32>
    %22 = math.tanh %21 : vector<128x128xf32>
    %cst_8 = arith.constant dense<0.000000e+00> : vector<128x128xf32>
    %23 = tpu.matmul %22, %12, %cst_8 {dimension_numbers = #tpu.dot_dimension_numbers<[1], [0], [0], [1], [0, 0, 1, 1], [], []>} : vector<128x128xf32>, vector<128x128xf32>, vector<128x128xf32> -> vector<128x128xf32>
    %24 = vector.broadcast %10 : vector<1x128xf32> to vector<128x128xf32>
    %25 = arith.addf %23, %24 : vector<128x128xf32>
    %26 = vector.extract_strided_slice %25 {offsets = [0, 0], sizes = [128, 2], strides = [1, 1]} : vector<128x128xf32> to vector<128x2xf32>
    %c0_9 = arith.constant 0 : index
    %c0_10 = arith.constant 0 : index
    %27 = vector.load %arg3[%c0_9, %c0_10] : memref<128x2xf32, #tpu.memory_space<vmem>>, vector<128x2xf32>
    tpu.vector_store %arg3[%c0_9, %c0_10], %26 {strides = array<i32>} : memref<128x2xf32, #tpu.memory_space<vmem>>, vector<128x2xf32>,
    return
  }
  func.func @transform_0(%arg0: i32) -> (i32, i32) {
    %c0_i32 = arith.constant 0 : i32
    %c0_i32_0 = arith.constant 0 : i32
    %c0_i32_1 = arith.constant 0 : i32
    return %c0_i32, %c0_i32_0 : i32, i32
  }
  func.func @transform_1(%arg0: i32) -> (i32, i32) {
    %c0_i32 = arith.constant 0 : i32
    %c0_i32_0 = arith.constant 0 : i32
    return %arg0, %c0_i32 : i32, i32
  }
  func.func @transform_2(%arg0: i32) -> (i32, i32) {
    %c0_i32 = arith.constant 0 : i32
    %c0_i32_0 = arith.constant 0 : i32
    return %arg0, %c0_i32 : i32, i32
  }
}

</mosaic_0001>

<bundles_post_ra>
// kernel: tpu_custom_call.1
= control target key start
LH: loop header
LB: loop body
LE: loop exit
PB: predicated region body
PF: predicated region fallthrough
CT: control target
= control target key end

     0   :  { %s1318_s9 = smov 0   ;;  %s1741_s0 = inlined_call_operand.vmem [shape: f32[264,128], index: 0, kind: input, shape index: {}]   ;;  %s1742_s1 = inlined_call_operand.vmem [shape: f32[256,8], index: 1, kind: input, shape index: {}]   ;;  %s1743_s2 = inlined_call_operand.vmem [shape: f32[256,2], index: 2, kind: output, shape index: {}]  }
   0x1 LB: > { %s930_s10 = sadd.s32 4294967295, %s1299_s9   ;;  %p934_p0 = scmp.ge.s32.totalorder %s1299_s9, 1  ;;  %s1299_s9 = sphi %s1318_s9, %s12_s9  }
   0x2   : > { %p113_p1 = scmp.lt.s32.totalorder %s1299_s9, 3 }
   0x4   : > { %p114_p2 = pnand %p934_p0, %p113_p1 }
   0x5   : > { %s935_s11 = sshll.u32 (!%p114_p2), %s930_s10, 4  ;;  %s1301_s16 = smov (!%p114_p2), 127   ;;  %v1302_v14 = vmov (!%p114_p2), 0   ;;  %v375_v33 = vld [vmem:[%s1741_s0 + $0x8] sm:$0xff] (!%p114_p2)  ;;  %v376_v34 = vld [vmem:[%s1741_s0 + $0x10] sm:$0xff] (!%p114_p2)  ;;  %v377_v35 = vld [vmem:[%s1741_s0 + $0x18] sm:$0xff] (!%p114_p2) }
   0x6   : > { %117 = sbr.rel (%p114_p2) target bundleno = 771 (0x303), region = 28  ;;  %p136_p3 = scmp.lt.s32.totalorder (!%p114_p2), %s935_s11, 31  ;;  %1195 = vset.pattern.permute.xlu0 (!%p114_p2), %v1302_v14  ;;  %1196 = vset.pattern.permute.xlu1 (!%p114_p2), %v1302_v14  ;;  %v1121_v36 = vpack.c.bf16 (!%p114_p2), %v376_v34, %v375_v33  ;;  %v378_v37 = vld [vmem:[%s1741_s0 + $0x20] sm:$0xff] (!%p114_p2)  ;;  %v379_v39 = vld [vmem:[%s1741_s0 + $0x28] sm:$0xff] (!%p114_p2)  ;;  %v380_v40 = vld [vmem:[%s1741_s0 + $0x30] sm:$0xff] (!%p114_p2) }
   0x7   : > { %v1125_v38 = vpack.c.bf16 (!%p114_p2), %v378_v37, %v377_v35  ;;  %v1129_v41 = vpack.c.bf16 (!%p114_p2), %v380_v40, %v379_v39  ;;  %v381_v42 = vld [vmem:[%s1741_s0 + $0x38] sm:$0xff] (!%p114_p2)  ;;  %v382_v43 = vld [vmem:[%s1741_s0 + $0x40] sm:$0xff] (!%p114_p2) }
   0x8   : > { %1122 = vmatprep.subr.bf16.mxu0 (!%p114_p2), %v1121_v36  ;;  %v1133_v44 = vpack.c.bf16 (!%p114_p2), %v382_v43, %v381_v42 }
   0x9   : > { %1124 = vmatpush3.bf16.msra.mxu0 (!%p114_p2), %v1121_v36 }
   0xa   : > { %1126 = vmatprep.subr.bf16.mxu0 (!%p114_p2), %v1125_v38 }
   0xd   : > { %s1745_s11 = smov (!%p136_p3, %s935_s11), 31  ;;  %1128 = vmatpush3.bf16.msra.mxu0 %v1125_v38 }
   0xe   : > { %s936_s12 = sshll.u32 %s1745_s11, 3  ;;  %1130 = vmatprep.subr.bf16.mxu0 %v1129_v41 }
   0xf   : > { %s1334_s15 = scalar_lea.vmem %s1742_s1, %s936_s12 }
  0x10   : > { %v149_v0 = vld [vmem:[%s1334_s15 + $0x10] sm:$0xff]  ;;  %v147_v1 = vld [vmem:[%s1334_s15] sm:$0xff]  ;;  %v150_v2 = vld [vmem:[%s1334_s15 + $0x18] sm:$0xff] }
  0x11   : > { %v1339_v3 = vmul.f32 %v149_v0, %v149_v0  ;;  %v1341_v4 = vmul.f32 %v147_v1, %v147_v1  ;;  %v148_v5 = vld [vmem:[%s1334_s15 + $0x8] sm:$0xff]  ;;  %v1348_v6 = vmul.f32 %v150_v2, %v150_v2  ;;  %v151_v9 = vld [vmem:[%s1334_s15 + $0x20] sm:$0xff]  ;;  %v154_v12 = vld [vmem:[%s1334_s15 + $0x38] sm:$0xff]  ;;  %1132 = vmatpush3.bf16.msra.mxu0 %v1129_v41 }
  0x12   : > { %v1350_v7 = vmul.f32 %v148_v5, %v148_v5  ;;  %v152_v8 = vld [vmem:[%s1334_s15 + $0x28] sm:$0xff]  ;;  %v1360_v11 = vmul.f32 %v151_v9, %v151_v9  ;;  %v153_v13 = vld [vmem:[%s1334_s15 + $0x30] sm:$0xff]  ;;  %v1368_v15 = vmul.f32 %v154_v12, %v154_v12  ;;  %v155_v18 = vld [vmem:[%s1334_s15 + $0x40] sm:$0xff]  ;;  %1134 = vmatprep.subr.bf16.mxu0 %v1133_v44 }
  0x13   : > { %199 = vrot.lane.b32.xlu1 %v1339_v3, %s1301_s16  ;;  %195 = vrot.lane.b32.xlu0 %v1341_v4, %s1301_s16  ;;  %v1358_v10 = vmul.f32 %v152_v8, %v152_v8  ;;  %v1370_v16 = vmul.f32 %v153_v13, %v153_v13  ;;  %v156_v17 = vld [vmem:[%s1334_s15 + $0x48] sm:$0xff]  ;;  %v1380_v20 = vmul.f32 %v155_v18, %v155_v18  ;;  %v158_v21 = vld [vmem:[%s1334_s15 + $0x58] sm:$0xff] }
  0x14   : > { %v1378_v19 = vmul.f32 %v156_v17, %v156_v17  ;;  %v157_v22 = vld [vmem:[%s1334_s15 + $0x50] sm:$0xff]  ;;  %v1388_v23 = vmul.f32 %v158_v21, %v158_v21  ;;  %v160_v25 = vld [vmem:[%s1334_s15 + $0x68] sm:$0xff]  ;;  %v159_v26 = vld [vmem:[%s1334_s15 + $0x60] sm:$0xff] }
  0x15   : > { %v1390_v24 = vmul.f32 %v157_v22, %v157_v22  ;;  %v1398_v27 = vmul.f32 %v160_v25, %v160_v25  ;;  %v1400_v28 = vmul.f32 %v159_v26, %v159_v26  ;;  %v162_v29 = vld [vmem:[%s1334_s15 + $0x78] sm:$0xff]  ;;  %v161_v30 = vld [vmem:[%s1334_s15 + $0x70] sm:$0xff]  ;;  %1136 = vmatpush3.bf16.msra.mxu0 %v1133_v44 }
  0x16   : > { %v1408_v31 = vmul.f32 %v162_v29, %v162_v29  ;;  %v1410_v32 = vmul.f32 %v161_v30, %v161_v30 }
  0x17   : > { %201 = vrot.lane.b32.xlu1 %v1348_v6, %s1301_s16  ;;  %197 = vrot.lane.b32.xlu0 %v1350_v7, %s1301_s16 }
  0x1b   : > { %205 = vrot.lane.b32.xlu1 %v1358_v10, %s1301_s16  ;;  %203 = vrot.lane.b32.xlu0 %v1360_v11, %s1301_s16 }
  0x1f   : > { %209 = vrot.lane.b32.xlu1 %v1368_v15, %s1301_s16  ;;  %207 = vrot.lane.b32.xlu0 %v1370_v16, %s1301_s16 }
  0x23   : > { %213 = vrot.lane.b32.xlu1 %v1378_v19, %s1301_s16  ;;  %211 = vrot.lane.b32.xlu0 %v1380_v20, %s1301_s16 }
  0x27   : > { %217 = vrot.lane.b32.xlu1 %v1388_v23, %s1301_s16  ;;  %215 = vrot.lane.b32.xlu0 %v1390_v24, %s1301_s16 }
  0x2b   : > { %221 = vrot.lane.b32.xlu1 %v1398_v27, %s1301_s16  ;;  %219 = vrot.lane.b32.xlu0 %v1400_v28, %s1301_s16 }
  0x2f   : > { %225 = vrot.lane.b32.xlu1 %v1408_v31, %s1301_s16  ;;  %223 = vrot.lane.b32.xlu0 %v1410_v32, %s1301_s16  ;;  %s1704_s16 = scalar_lea.vmem %s1743_s2, %s936_s12 }
  0x85   : > { %v200_v45 = vpop.permute.xlu1 %199  ;;  %v196_v46 = vpop.permute.xlu0 %195 }
  0x86   : > { %v243_v47 = vadd.f32 %v196_v46, %v1341_v4  ;;  %v1442_v48 = vadd.f32 %v200_v45, %v1339_v3 }
  0x88   : > { %1197 = vrsqrt.f32 %v243_v47  ;;  %vm261_vm0 = vcmp.eq.f32.partialorder %v243_v47, inf  ;;  %vm263_vm1 = vcmp.eq.f32.partialorder %v243_v47, 0.0  ;;  %v264_v2 = vand.u32 2147483648, %v243_v47 }
  0x89   : > { %v202_v49 = vpop.permute.xlu1 %201  ;;  %v198_v50 = vpop.permute.xlu0 %197  ;;  %1199 = vrsqrt.f32 %v1442_v48  ;;  %vm275_vm7 = vcmp.eq.f32.partialorder %v1442_v48, inf  ;;  %v278_v35 = vand.u32 2147483648, %v1442_v48  ;;  %vm277_vm9 = vcmp.eq.f32.partialorder %v1442_v48, 0.0 }
  0x8a   : > { %v246_v51 = vadd.f32 %v202_v49, %v1348_v6  ;;  %v244_v52 = vadd.f32 %v198_v50, %v1350_v7 }
  0x8c   : > { %1201 = vrsqrt.f32 %v246_v51  ;;  %vm282_vm2 = vcmp.eq.f32.partialorder %v246_v51, inf  ;;  %vm284_vm3 = vcmp.eq.f32.partialorder %v246_v51, 0.0  ;;  %vm268_vm4 = vcmp.eq.f32.partialorder %v244_v52, inf }
  0x8d   : > { %1203 = vrsqrt.f32 %v244_v52  ;;  %v206_v53 = vpop.permute.xlu1 %205  ;;  %v204_v54 = vpop.permute.xlu0 %203  ;;  %vm270_vm5 = vcmp.eq.f32.partialorder %v244_v52, 0.0 }
  0x8e   : > { %v1448_v55 = vadd.f32 %v206_v53, %v1358_v10  ;;  %v1451_v56 = vadd.f32 %v204_v54, %v1360_v11  ;;  %v285_v10 = vand.u32 2147483648, %v246_v51 }
  0x90   : > { %1205 = vrsqrt.f32 %v1448_v55  ;;  %vm296_vm6 = vcmp.eq.f32.partialorder %v1448_v55, inf  ;;  %vm298_vm8 = vcmp.eq.f32.partialorder %v1448_v55, 0.0  ;;  %vm289_vm11 = vcmp.eq.f32.partialorder %v1451_v56, inf }
  0x91   : > { %1207 = vrsqrt.f32 %v1451_v56  ;;  %v210_v57 = vpop.permute.xlu1 %209  ;;  %v208_v58 = vpop.permute.xlu0 %207  ;;  %vm291_vm13 = vcmp.eq.f32.partialorder %v1451_v56, 0.0 }
  0x92   : > { %v1456_v59 = vadd.f32 %v210_v57, %v1368_v15  ;;  %v1459_v60 = vadd.f32 %v208_v58, %v1370_v16  ;;  %v1198_v61 = vpop.eup %1197  ;;  %v271_v16 = vand.u32 2147483648, %v244_v52  ;;  %v384_v57 = vld [vmem:[%s1741_s0 + $0x50] sm:$0xff]  ;;  %v385_v58 = vld [vmem:[%s1741_s0 + $0x58] sm:$0xff] }
  0x93   : > { %v260_v62 = vmul.f32 %v1198_v61, %v243_v47  ;;  %v1200_v63 = vpop.eup %1199 }
  0x94   : > { %1209 = vrsqrt.f32 %v1456_v59  ;;  %v274_v12 = vmul.f32 %v1200_v63, %v1442_v48  ;;  %vm310_vm10 = vcmp.eq.f32.partialorder %v1456_v59, inf  ;;  %vm312_vm12 = vcmp.eq.f32.partialorder %v1456_v59, 0.0 }
  0x95   : > { %1211 = vrsqrt.f32 %v1459_v60  ;;  %v214_v0 = vpop.permute.xlu1 %213  ;;  %v212_v1 = vpop.permute.xlu0 %211  ;;  %v262_v6 = vsel %vm261_vm0, %v243_v47, %v260_v62  ;;  %v292_v47 = vand.u32 2147483648, %v1451_v56  ;;  %vm303_vm15 = vcmp.eq.f32.partialorder %v1459_v60, inf }
  0x96   : > { %v1202_v3 = vpop.eup %1201  ;;  %v1464_v4 = vadd.f32 %v214_v0, %v1378_v19  ;;  %v1467_v5 = vadd.f32 %v212_v1, %v1380_v20  ;;  %v265_v8 = vsel %vm263_vm1, %v264_v2, %v262_v6  ;;  %v306_v62 = vand.u32 2147483648, %v1459_v60 }
  0x97   : > { %v1204_v7 = vpop.eup %1203  ;;  %v281_v9 = vmul.f32 %v1202_v3, %v246_v51  ;;  %409 = vperm.xlu0 %1195, %v265_v8   ;;  %vm305_vm1 = vcmp.eq.f32.partialorder %v1459_v60, 0.0 }
  0x98   : > { %1213 = vrsqrt.f32 %v1464_v4  ;;  %v267_v11 = vmul.f32 %v1204_v7, %v244_v52  ;;  %vm324_vm14 = vcmp.eq.f32.partialorder %v1464_v4, inf  ;;  %vm326_vm0 = vcmp.eq.f32.partialorder %v1464_v4, 0.0 }
  0x99   : > { %1215 = vrsqrt.f32 %v1467_v5  ;;  %v218_v13 = vpop.permute.xlu1 %217  ;;  %v216_v14 = vpop.permute.xlu0 %215  ;;  %v283_v15 = vsel %vm282_vm2, %v246_v51, %v281_v9  ;;  %vm317_vm2 = vcmp.eq.f32.partialorder %v1467_v5, inf }
  0x9a   : > { %v1206_v17 = vpop.eup %1205  ;;  %v1473_v18 = vadd.f32 %v218_v13, %v1388_v23  ;;  %v1476_v19 = vadd.f32 %v216_v14, %v1390_v24  ;;  %v286_v20 = vsel %vm284_vm3, %v285_v10, %v283_v15  ;;  %v269_v21 = vsel %vm268_vm4, %v244_v52, %v267_v11  ;;  %v388_v10 = vld [vmem:[%s1741_s0 + $0x70] sm:$0xff] }
  0x9b   : > { %v1208_v22 = vpop.eup %1207  ;;  %v272_v25 = vsel %vm270_vm5, %v271_v16, %v269_v21  ;;  %v295_v26 = vmul.f32 %v1206_v17, %v1448_v55  ;;  %424 = vperm.xlu0 %1195, %v286_v20   ;;  %v299_v23 = vand.u32 2147483648, %v1448_v55  ;;  %v276_v24 = vsel %vm275_vm7, %v1442_v48, %v274_v12 }
  0x9c   : > { %1217 = vrsqrt.f32 %v1473_v18  ;;  %414 = vperm.xlu1 %1196, %v272_v25   ;;  %v288_v29 = vmul.f32 %v1208_v22, %v1451_v56  ;;  %v279_v41 = vsel %vm277_vm9, %v278_v35, %v276_v24  ;;  %vm338_vm3 = vcmp.eq.f32.partialorder %v1473_v18, inf  ;;  %v390_v25 = vld [vmem:[%s1741_s0 + $0x80] sm:$0xff] }
  0x9d   : > { %1219 = vrsqrt.f32 %v1476_v19  ;;  %v222_v30 = vpop.permute.xlu1 %221  ;;  %v220_v33 = vpop.permute.xlu0 %219  ;;  %v297_v34 = vsel %vm296_vm6, %v1448_v55, %v295_v26  ;;  %v383_v55 = vld [vmem:[%s1741_s0 + $0x48] sm:$0xff]  ;;  %vm340_vm4 = vcmp.eq.f32.partialorder %v1473_v18, 0.0  ;;  %v320_v12 = vand.u32 2147483648, %v1467_v5 }
  0x9e   : > { %v1210_v36 = vpop.eup %1209  ;;  %v1491_v37 = vadd.f32 %v222_v30, %v1398_v27  ;;  %v1494_v38 = vadd.f32 %v220_v33, %v1400_v28  ;;  %v300_v39 = vsel %vm298_vm8, %v299_v23, %v297_v34  ;;  %v313_v27 = vand.u32 2147483648, %v1456_v59 }
  0x9f   : > { %v1212_v40 = vpop.eup %1211  ;;  %v309_v42 = vmul.f32 %v1210_v36, %v1456_v59  ;;  %434 = vperm.xlu0 %1195, %v300_v39   ;;  %v290_v28 = vsel %vm289_vm11, %v1451_v56, %v288_v29  ;;  %v1137_v6 = vpack.c.bf16 %v384_v57, %v383_v55  ;;  %vm319_vm5 = vcmp.eq.f32.partialorder %v1467_v5, 0.0  ;;  %v1612_v55 = vld [vmem:[%s1741_s0] ss:$0 sm:$0xff] }
  0xa0   : > { %1221 = vrsqrt.f32 %v1491_v37  ;;  %419 = vperm.xlu1 %1196, %v279_v41   ;;  %v302_v43 = vmul.f32 %v1212_v40, %v1459_v60  ;;  %v293_v53 = vsel %vm291_vm13, %v292_v47, %v290_v28  ;;  %vm331_vm6 = vcmp.eq.f32.partialorder %v1476_v19, inf  ;;  %v394_v47 = vld [vmem:[%s1741_s0 + $0xa0] sm:$0xff] }
  0xa1   : > { %1223 = vrsqrt.f32 %v1494_v38  ;;  %v226_v44 = vpop.permute.xlu1 %225  ;;  %v224_v45 = vpop.permute.xlu0 %223  ;;  %v311_v46 = vsel %vm310_vm10, %v1456_v59, %v309_v42  ;;  %v386_v59 = vld [vmem:[%s1741_s0 + $0x60] sm:$0xff]  ;;  %1138 = vmatprep.subr.bf16.mxu0 %v1137_v6  ;;  %vm352_vm7 = vcmp.eq.f32.partialorder %v1491_v37, inf  ;;  %vm354_vm8 = vcmp.eq.f32.partialorder %v1491_v37, 0.0 }
  0xa2   : > { %v1214_v48 = vpop.eup %1213  ;;  %v1509_v49 = vadd.f32 %v226_v44, %v1408_v31  ;;  %v1512_v50 = vadd.f32 %v224_v45, %v1410_v32  ;;  %v314_v51 = vsel %vm312_vm12, %v313_v27, %v311_v46  ;;  %v327_v31 = vand.u32 2147483648, %v1464_v4  ;;  %1140 = vmatpush3.bf16.msra.mxu0 %v1137_v6  ;;  %v392_v44 = vld [vmem:[%s1741_s0 + $0x90] sm:$0xff]  ;;  %v393_v45 = vld [vmem:[%s1741_s0 + $0x98] sm:$0xff] }
  0xa3   : > { %v1216_v52 = vpop.eup %1215  ;;  %v323_v54 = vmul.f32 %v1214_v48, %v1464_v4  ;;  %444 = vperm.xlu0 %1195, %v314_v51   ;;  %v304_v32 = vsel %vm303_vm15, %v1459_v60, %v302_v43  ;;  %v1141_v7 = vpack.c.bf16 %v386_v59, %v385_v58  ;;  %v387_v60 = vld [vmem:[%s1741_s0 + $0x68] sm:$0xff]  ;;  %v334_v23 = vand.u32 2147483648, %v1476_v19 }
  0xa4   : > { %1225 = vrsqrt.f32 %v1509_v49  ;;  %429 = vperm.xlu1 %1196, %v293_v53   ;;  %v316_v56 = vmul.f32 %v1216_v52, %v1467_v5  ;;  %v307_v2 = vsel %vm305_vm1, %v306_v62, %v304_v32  ;;  %v1145_v20 = vpack.c.bf16 %v388_v10, %v387_v60  ;;  %v397_v52 = vld [vmem:[%s1741_s0 + $0xb8] sm:$0xff]  ;;  %v398_v53 = vld [vmem:[%s1741_s0 + $0xc0] sm:$0xff] }
  0xa5   : > { %1227 = vrsqrt.f32 %v1512_v50  ;;  %v325_v61 = vsel %vm324_vm14, %v1464_v4, %v323_v54  ;;  %v341_v4 = vand.u32 2147483648, %v1473_v18  ;;  %1142 = vmatprep.subr.bf16.mxu0 %v1141_v7  ;;  %vm333_vm9 = vcmp.eq.f32.partialorder %v1476_v19, 0.0 }
  0xa6   : > { %v1218_v63 = vpop.eup %1217  ;;  %v328_v0 = vsel %vm326_vm0, %v327_v31, %v325_v61  ;;  %v318_v8 = vsel %vm317_vm2, %v1467_v5, %v316_v56  ;;  %v389_v5 = vld [vmem:[%s1741_s0 + $0x78] sm:$0xff]  ;;  %1144 = vmatpush3.bf16.msra.mxu0 %v1141_v7  ;;  %vm345_vm10 = vcmp.eq.f32.partialorder %v1494_v38, inf  ;;  %vm366_vm11 = vcmp.eq.f32.partialorder %v1509_v49, inf  ;;  %v1617_v31 = vld [vmem:[%s1741_s0 + $0x1] ss:$0 sm:$0xff] }
  0xa7   : > { %v1220_v1 = vpop.eup %1219  ;;  %v337_v3 = vmul.f32 %v1218_v63, %v1473_v18  ;;  %454 = vperm.xlu0 %1195, %v328_v0   ;;  %v321_v16 = vsel %vm319_vm5, %v320_v12, %v318_v8  ;;  %1146 = vmatprep.subr.bf16.mxu0 %v1145_v20  ;;  %v1149_v35 = vpack.c.bf16 %v390_v25, %v389_v5  ;;  %v369_v36 = vand.u32 2147483648, %v1509_v49 }
  0xa8   : > { %439 = vperm.xlu1 %1196, %v307_v2   ;;  %v330_v9 = vmul.f32 %v1220_v1, %v1476_v19  ;;  %vm368_vm12 = vcmp.eq.f32.partialorder %v1509_v49, 0.0  ;;  %v348_v40 = vand.u32 2147483648, %v1494_v38  ;;  %vm347_vm13 = vcmp.eq.f32.partialorder %v1494_v38, 0.0 }
  0xa9   : > { %v339_v11 = vsel %vm338_vm3, %v1473_v18, %v337_v3  ;;  %v355_v18 = vand.u32 2147483648, %v1491_v37  ;;  %vm359_vm14 = vcmp.eq.f32.partialorder %v1512_v50, inf  ;;  %v362_v28 = vand.u32 2147483648, %v1512_v50 }
  0xaa   : > { %v1222_v13 = vpop.eup %1221  ;;  %v342_v14 = vsel %vm340_vm4, %v341_v4, %v339_v11  ;;  %v332_v21 = vsel %vm331_vm6, %v1476_v19, %v330_v9  ;;  %1148 = vmatpush3.bf16.msra.mxu0 %v1145_v20  ;;  %vm361_vm15 = vcmp.eq.f32.partialorder %v1512_v50, 0.0  ;;  %v1157_v48 = vpack.c.bf16 %v394_v47, %v393_v45 }
  0xab   : > { %v1224_v15 = vpop.eup %1223  ;;  %v351_v17 = vmul.f32 %v1222_v13, %v1491_v37  ;;  %464 = vperm.xlu0 %1195, %v342_v14   ;;  %v335_v33 = vsel %vm333_vm9, %v334_v23, %v332_v21  ;;  %1150 = vmatprep.subr.bf16.mxu0 %v1149_v35  ;;  %v1165_v54 = vpack.c.bf16 %v398_v53, %v397_v52  ;;  %vm857_vm0 = vcmask 15360  }
  0xac   : > { %449 = vperm.xlu1 %1196, %v321_v16   ;;  %v344_v22 = vmul.f32 %v1224_v15, %v1494_v38 }
  0xad   : > { %v353_v26 = vsel %vm352_vm7, %v1491_v37, %v351_v17 }
  0xae   : > { %v1226_v24 = vpop.eup %1225  ;;  %v356_v29 = vsel %vm354_vm8, %v355_v18, %v353_v26  ;;  %v346_v37 = vsel %vm345_vm10, %v1494_v38, %v344_v22  ;;  %1152 = vmatpush3.bf16.msra.mxu0 %v1149_v35  ;;  %v391_v38 = vld [vmem:[%s1741_s0 + $0x88] sm:$0xff] }
  0xaf   : > { %v1228_v30 = vpop.eup %1227  ;;  %v365_v34 = vmul.f32 %v1226_v24, %v1509_v49  ;;  %474 = vperm.xlu0 %1195, %v356_v29   ;;  %v349_v42 = vsel %vm347_vm13, %v348_v40, %v346_v37  ;;  %v1153_v46 = vpack.c.bf16 %v392_v44, %v391_v38 }
  0xb0   : > { %459 = vperm.xlu1 %1196, %v335_v33   ;;  %v358_v39 = vmul.f32 %v1228_v30, %v1512_v50 }
  0xb1   : > { %v367_v19 = vsel %vm366_vm11, %v1509_v49, %v365_v34  ;;  %v395_v49 = vld [vmem:[%s1741_s0 + $0xa8] sm:$0xff]  ;;  %1154 = vmatprep.subr.bf16.mxu1 %v1153_v46 }
  0xb2   : > { %v370_v41 = vsel %vm368_vm12, %v369_v36, %v367_v19  ;;  %v360_v27 = vsel %vm359_vm14, %v1512_v50, %v358_v39  ;;  %v396_v50 = vld [vmem:[%s1741_s0 + $0xb0] sm:$0xff]  ;;  %1156 = vmatpush3.bf16.msra.mxu1 %v1153_v46 }
  0xb3   : > { %484 = vperm.xlu0 %1195, %v370_v41   ;;  %v363_v43 = vsel %vm361_vm15, %v362_v28, %v360_v27  ;;  %1158 = vmatprep.subr.bf16.mxu1 %v1157_v48  ;;  %v1161_v51 = vpack.c.bf16 %v396_v50, %v395_v49 }
  0xb4   : > { %469 = vperm.xlu1 %1196, %v349_v42  }
  0xb6   : > { %1160 = vmatpush3.bf16.msra.mxu1 %v1157_v48 }
  0xb7   : > { %1162 = vmatprep.subr.bf16.mxu1 %v1161_v51 }
  0xb8   : > { %479 = vperm.xlu1 %1196, %v363_v43  }
  0xba   : > { %1164 = vmatpush3.bf16.msra.mxu1 %v1161_v51 }
  0xbb   : > { %1166 = vmatprep.subr.bf16.mxu1 %v1165_v54 }
  0xbe   : > { %1168 = vmatpush3.bf16.msra.mxu1 %v1165_v54 }
 0x116   : > { %v410_v32 = vpop.permute.xlu0 %409 }
 0x117   : > { %v491_v56 = vmul.f32 %v1612_v55, %v410_v32 }
 0x119   : > { %v511_v57 = vadd.f32 %v1617_v31, %v491_v56  ;;  %v400_v56 = vld [vmem:[%s1741_s0 + $0xd0] sm:$0xff] }
 0x11a   : > { %v425_v59 = vpop.permute.xlu0 %424 }
 0x11b   : > { %v415_v58 = vpop.permute.xlu1 %414  ;;  %1229 = vtanh.f32 %v511_v57  ;;  %v494_v62 = vmul.f32 %v1612_v55, %v425_v59  ;;  %v402_v59 = vld [vmem:[%s1741_s0 + $0xe0] sm:$0xff] }
 0x11c   : > { %v492_v61 = vmul.f32 %v1612_v55, %v415_v58  ;;  %v401_v58 = vld [vmem:[%s1741_s0 + $0xd8] sm:$0xff] }
 0x11d   : > { %v514_v3 = vadd.f32 %v1617_v31, %v494_v62  ;;  %v403_v62 = vld [vmem:[%s1741_s0 + $0xe8] sm:$0xff] }
 0x11e   : > { %v512_v63 = vadd.f32 %v1617_v31, %v492_v61  ;;  %v435_v1 = vpop.permute.xlu0 %434  ;;  %v1173_v61 = vpack.c.bf16 %v402_v59, %v401_v58 }
 0x11f   : > { %v420_v0 = vpop.permute.xlu1 %419  ;;  %v496_v6 = vmul.f32 %v1612_v55, %v435_v1  ;;  %v405_v1 = vld [vmem:[%s1741_s0 + $0xf8] sm:$0xff] }
 0x120   : > { %1231 = vtanh.f32 %v512_v63  ;;  %v493_v2 = vmul.f32 %v1612_v55, %v420_v0  ;;  %v404_v63 = vld [vmem:[%s1741_s0 + $0xf0] sm:$0xff] }
 0x121   : > { %v516_v60 = vadd.f32 %v1617_v31, %v496_v6  ;;  %v1177_v0 = vpack.c.bf16 %v404_v63, %v403_v62  ;;  %v1678_v6 = vld [vmem:[%s1741_s0 + $0x2] ss:$0 sm:$0xff] }
 0x122   : > { %v513_v7 = vadd.f32 %v1617_v31, %v493_v2  ;;  %v445_v8 = vpop.permute.xlu0 %444  ;;  %v406_v2 = vld [vmem:[%s1741_s0 + $0x100] sm:$0xff] }
 0x123   : > { %v430_v4 = vpop.permute.xlu1 %429  ;;  %v498_v10 = vmul.f32 %v1612_v55, %v445_v8 }
 0x124   : > { %1233 = vtanh.f32 %v513_v7  ;;  %v495_v9 = vmul.f32 %v1612_v55, %v430_v4 }
 0x125   : > { %1235 = vtanh.f32 %v514_v3  ;;  %v1230_v11 = vpop.eup %1229  ;;  %v518_v16 = vadd.f32 %v1617_v31, %v498_v10  ;;  %v1181_v3 = vpack.c.bf16 %v406_v2, %v405_v1 }
 0x126   : > { %v515_v12 = vadd.f32 %v1617_v31, %v495_v9  ;;  %1041 = vmatprep.mubr.f32.mxu0 %v1230_v11  ;;  %v455_v14 = vpop.permute.xlu0 %454 }
 0x127   : > { %v440_v13 = vpop.permute.xlu1 %439  ;;  %v500_v17 = vmul.f32 %v1612_v55, %v455_v14 }
 0x128   : > { %1237 = vtanh.f32 %v515_v12  ;;  %v497_v15 = vmul.f32 %v1612_v55, %v440_v13 }
 0x129   : > { %1239 = vtanh.f32 %v516_v60  ;;  %v520_v25 = vadd.f32 %v1617_v31, %v500_v17 }
 0x12a   : > { %v1232_v20 = vpop.eup %1231  ;;  %v517_v18 = vadd.f32 %v1617_v31, %v497_v15  ;;  %v465_v22 = vpop.permute.xlu0 %464 }
 0x12b   : > { %v450_v21 = vpop.permute.xlu1 %449  ;;  %1042 = vmatmul.mubr.f32.vlgmr.msra.gmra.mrb[0].mxu0 %v1232_v20  ;;  %v502_v26 = vmul.f32 %v1612_v55, %v465_v22 }
 0x12c   : > { %1241 = vtanh.f32 %v517_v18  ;;  %v499_v5 = vmul.f32 %v1612_v55, %v450_v21 }
 0x12d   : > { %1243 = vtanh.f32 %v518_v16  ;;  %v522_v35 = vadd.f32 %v1617_v31, %v502_v26 }
 0x12e   : > { %v1234_v23 = vpop.eup %1233  ;;  %v519_v24 = vadd.f32 %v1617_v31, %v499_v5  ;;  %v475_v33 = vpop.permute.xlu0 %474 }
 0x12f   : > { %v1236_v29 = vpop.eup %1235  ;;  %v460_v30 = vpop.permute.xlu1 %459  ;;  %1044 = vmatprep.mubr.f32.mxu0 %v1234_v23  ;;  %v504_v36 = vmul.f32 %v1612_v55, %v475_v33 }
 0x130   : > { %1245 = vtanh.f32 %v519_v24  ;;  %v501_v34 = vmul.f32 %v1612_v55, %v460_v30  ;;  %1045 = vmatmul.mubr.f32.gmra.mrb[2].mxu0 %v1236_v29 }
 0x131   : > { %1247 = vtanh.f32 %v520_v25  ;;  %v524_v27 = vadd.f32 %v1617_v31, %v504_v36 }
 0x132   : > { %v1238_v37 = vpop.eup %1237  ;;  %v521_v39 = vadd.f32 %v1617_v31, %v501_v34  ;;  %v485_v41 = vpop.permute.xlu0 %484 }
 0x133   : > { %v1240_v19 = vpop.eup %1239  ;;  %v470_v40 = vpop.permute.xlu1 %469  ;;  %1047 = vmatprep.mubr.f32.mxu0 %v1238_v37  ;;  %v506_v28 = vmul.f32 %v1612_v55, %v485_v41 }
 0x134   : > { %1249 = vtanh.f32 %v521_v39  ;;  %v503_v42 = vmul.f32 %v1612_v55, %v470_v40  ;;  %1048 = vmatmul.mubr.f32.gmra.mrb[4].mxu0 %v1240_v19 }
 0x135   : > { %1251 = vtanh.f32 %v522_v35  ;;  %v526_v47 = vadd.f32 %v1617_v31, %v506_v28 }
 0x136   : > { %v1242_v43 = vpop.eup %1241  ;;  %v523_v38 = vadd.f32 %v1617_v31, %v503_v42 }
 0x137   : > { %v1244_v44 = vpop.eup %1243  ;;  %v480_v45 = vpop.permute.xlu1 %479  ;;  %1050 = vmatprep.mubr.f32.mxu0 %v1242_v43 }
 0x138   : > { %1253 = vtanh.f32 %v523_v38  ;;  %v505_v46 = vmul.f32 %v1612_v55, %v480_v45  ;;  %1051 = vmatmul.mubr.f32.gmra.mrb[6].mxu0 %v1244_v44 }
 0x139   : > { %1255 = vtanh.f32 %v524_v27 }
 0x13a   : > { %v1246_v48 = vpop.eup %1245  ;;  %v525_v49 = vadd.f32 %v1617_v31, %v505_v46  ;;  %v399_v31 = vld [vmem:[%s1741_s0 + $0xc8] sm:$0xff] }
 0x13b   : > { %v1248_v50 = vpop.eup %1247  ;;  %1053 = vmatprep.mubr.f32.mxu0 %v1246_v48  ;;  %v1169_v57 = vpack.c.bf16 %v400_v56, %v399_v31 }
 0x13c   : > { %1257 = vtanh.f32 %v525_v49  ;;  %1054 = vmatmul.mubr.f32.gmra.mrb[8].mxu0 %v1248_v50 }
 0x13d   : > { %1259 = vtanh.f32 %v526_v47  ;;  %1170 = vmatprep.subr.bf16.mxu1 %v1169_v57 }
 0x13e   : > { %v1250_v51 = vpop.eup %1249  ;;  %1172 = vmatpush3.bf16.msra.mxu1 %v1169_v57 }
 0x13f   : > { %v1252_v52 = vpop.eup %1251  ;;  %1056 = vmatprep.mubr.f32.mxu0 %v1250_v51  ;;  %1174 = vmatprep.subr.bf16.mxu1 %v1173_v61 }
 0x140   : > { %1057 = vmatmul.mubr.f32.gmra.mrb[10].mxu0 %v1252_v52 }
 0x142   : > { %v1254_v53 = vpop.eup %1253  ;;  %1176 = vmatpush3.bf16.msra.mxu1 %v1173_v61 }
 0x143   : > { %v1256_v54 = vpop.eup %1255  ;;  %1059 = vmatprep.mubr.f32.mxu0 %v1254_v53  ;;  %1178 = vmatprep.subr.bf16.mxu1 %v1177_v0 }
 0x144   : > { %1060 = vmatmul.mubr.f32.gmra.mrb[12].mxu0 %v1256_v54  ;;  %v942_v54 = vld [vmem:[%s1741_s0 + $0x3] ss:$0 sm:$0xff] }
 0x146   : > { %v1258_v55 = vpop.eup %1257  ;;  %1180 = vmatpush3.bf16.msra.mxu1 %v1177_v0 }
 0x147   : > { %v1260_v32 = vpop.eup %1259  ;;  %1062 = vmatprep.mubr.f32.mxu0 %v1258_v55  ;;  %1182 = vmatprep.subr.bf16.mxu1 %v1181_v3 }
 0x148   : > { %1063 = vmatmul.mubr.f32.gmra.mrb[14].mxu0 %v1260_v32 }
 0x14a   : > { %1184 = vmatpush3.bf16.msra.mxu1 %v1181_v3 }
 0x1fe   : > { %v1043_v7 = vpop.f32.mrb[0].mxu0 }
 0x1ff   : > { %v619_v4 = vadd.f32 %v1043_v7, %v1678_v6  ;;  %v613_v8 = vpop.f32.mrb[1].mxu0 }
 0x200   : > { %v614_v9 = vadd.f32 %v1678_v6, %v613_v8 }
 0x202   : > { %1261 = vtanh.f32 %v614_v9 }
 0x203   : > { %1263 = vtanh.f32 %v619_v4  ;;  %v1046_v60 = vpop.f32.mrb[2].mxu0 }
 0x204   : > { %v629_v10 = vadd.f32 %v1046_v60, %v1678_v6  ;;  %v623_v11 = vpop.f32.mrb[3].mxu0 }
 0x205   : > { %v624_v12 = vadd.f32 %v1678_v6, %v623_v11 }
 0x207   : > { %1265 = vtanh.f32 %v624_v12  ;;  %v1049_v13 = vpop.f32.mrb[4].mxu0 }
 0x208   : > { %1267 = vtanh.f32 %v629_v10  ;;  %v639_v14 = vadd.f32 %v1049_v13, %v1678_v6  ;;  %v633_v15 = vpop.f32.mrb[5].mxu0 }
 0x209   : > { %v634_v16 = vadd.f32 %v1678_v6, %v633_v15 }
 0x20b   : > { %1269 = vtanh.f32 %v634_v16  ;;  %v1052_v17 = vpop.f32.mrb[6].mxu0 }
 0x20c   : > { %v1262_v20 = vpop.eup %1261  ;;  %1271 = vtanh.f32 %v639_v14  ;;  %v649_v18 = vadd.f32 %v1052_v17, %v1678_v6  ;;  %v643_v21 = vpop.f32.mrb[7].mxu0 }
 0x20d   : > { %v1264_v22 = vpop.eup %1263  ;;  %v644_v5 = vadd.f32 %v1678_v6, %v643_v21  ;;  %1097 = vmatprep.mubr.f32.mxu1 %v1262_v20 }
 0x20e   : > { %1098 = vmatmul.mubr.f32.vlgmr.msra.gmra.mrb[0].mxu1 %v1264_v22 }
 0x20f   : > { %1273 = vtanh.f32 %v644_v5  ;;  %v1055_v25 = vpop.f32.mrb[8].mxu0 }
 0x210   : > { %1275 = vtanh.f32 %v649_v18  ;;  %v659_v26 = vadd.f32 %v1055_v25, %v1678_v6  ;;  %v653_v23 = vpop.f32.mrb[9].mxu0 }
 0x211   : > { %v1266_v24 = vpop.eup %1265  ;;  %v654_v29 = vadd.f32 %v1678_v6, %v653_v23 }
 0x212   : > { %v1268_v30 = vpop.eup %1267  ;;  %1100 = vmatprep.mubr.f32.mxu1 %v1266_v24 }
 0x213   : > { %1277 = vtanh.f32 %v654_v29  ;;  %v1058_v33 = vpop.f32.mrb[10].mxu0  ;;  %1101 = vmatmul.mubr.f32.gmra.mrb[2].mxu1 %v1268_v30 }
 0x214   : > { %1279 = vtanh.f32 %v659_v26  ;;  %v669_v34 = vadd.f32 %v1058_v33, %v1678_v6  ;;  %v663_v35 = vpop.f32.mrb[11].mxu0 }
 0x215   : > { %v1270_v36 = vpop.eup %1269  ;;  %v664_v37 = vadd.f32 %v1678_v6, %v663_v35 }
 0x216   : > { %v1272_v39 = vpop.eup %1271  ;;  %1103 = vmatprep.mubr.f32.mxu1 %v1270_v36 }
 0x217   : > { %1281 = vtanh.f32 %v664_v37  ;;  %v1061_v19 = vpop.f32.mrb[12].mxu0  ;;  %1104 = vmatmul.mubr.f32.gmra.mrb[4].mxu1 %v1272_v39 }
 0x218   : > { %1283 = vtanh.f32 %v669_v34  ;;  %v679_v40 = vadd.f32 %v1061_v19, %v1678_v6  ;;  %v673_v41 = vpop.f32.mrb[13].mxu0 }
 0x219   : > { %v1274_v42 = vpop.eup %1273  ;;  %v674_v27 = vadd.f32 %v1678_v6, %v673_v41 }
 0x21a   : > { %v1276_v28 = vpop.eup %1275  ;;  %1106 = vmatprep.mubr.f32.mxu1 %v1274_v42 }
 0x21b   : > { %1285 = vtanh.f32 %v674_v27  ;;  %v1064_v43 = vpop.f32.mrb[14].mxu0  ;;  %1107 = vmatmul.mubr.f32.gmra.mrb[6].mxu1 %v1276_v28 }
 0x21c   : > { %1287 = vtanh.f32 %v679_v40  ;;  %v689_v38 = vadd.f32 %v1064_v43, %v1678_v6  ;;  %v683_v44 = vpop.f32.mrb[15].mxu0 }
 0x21d   : > { %v1278_v45 = vpop.eup %1277  ;;  %v684_v46 = vadd.f32 %v1678_v6, %v683_v44 }
 0x21e   : > { %v1280_v47 = vpop.eup %1279  ;;  %1109 = vmatprep.mubr.f32.mxu1 %v1278_v45 }
 0x21f   : > { %1289 = vtanh.f32 %v684_v46  ;;  %1110 = vmatmul.mubr.f32.gmra.mrb[8].mxu1 %v1280_v47 }
 0x220   : > { %1291 = vtanh.f32 %v689_v38 }
 0x221   : > { %v1282_v48 = vpop.eup %1281 }
 0x222   : > { %v1284_v49 = vpop.eup %1283  ;;  %1112 = vmatprep.mubr.f32.mxu1 %v1282_v48 }
 0x223   : > { %1113 = vmatmul.mubr.f32.gmra.mrb[10].mxu1 %v1284_v49 }
 0x225   : > { %v1286_v50 = vpop.eup %1285 }
 0x226   : > { %v1288_v51 = vpop.eup %1287  ;;  %1115 = vmatprep.mubr.f32.mxu1 %v1286_v50 }
 0x227   : > { %1116 = vmatmul.mubr.f32.gmra.mrb[12].mxu1 %v1288_v51 }
 0x229   : > { %v1290_v52 = vpop.eup %1289 }
 0x22a   : > { %v1292_v53 = vpop.eup %1291  ;;  %1118 = vmatprep.mubr.f32.mxu1 %v1290_v52 }
 0x22b   : > { %1119 = vmatmul.mubr.f32.gmra.mrb[14].mxu1 %v1292_v53 }
 0x2e1   : > { %v1099_v55 = vpop.f32.mrb[0].mxu1 }
 0x2e2   : > { %v784_v32 = vadd.f32 %v1099_v55, %v942_v54  ;;  %v778_v31 = vpop.f32.mrb[1].mxu1 }
 0x2e3   : > { %v779_v56 = vadd.f32 %v942_v54, %v778_v31 }
 0x2e4   : > { %859 = vst.msk [vmem:[%s1704_s16 + $0x8] sm:$0xff] %vm857_vm0, %v784_v32 }
 0x2e5   : > { %858 = vst.msk [vmem:[%s1704_s16] sm:$0xff] %vm857_vm0, %v779_v56 }
 0x2e6   : > { %v1102_v57 = vpop.f32.mrb[2].mxu1 }
 0x2e7   : > { %v794_v58 = vadd.f32 %v1102_v57, %v942_v54  ;;  %v788_v59 = vpop.f32.mrb[3].mxu1 }
 0x2e8   : > { %v789_v61 = vadd.f32 %v942_v54, %v788_v59 }
 0x2e9   : > { %861 = vst.msk [vmem:[%s1704_s16 + $0x18] sm:$0xff] %vm857_vm0, %v794_v58 }
 0x2ea   : > { %860 = vst.msk [vmem:[%s1704_s16 + $0x10] sm:$0xff] %vm857_vm0, %v789_v61  ;;  %v1105_v62 = vpop.f32.mrb[4].mxu1 }
 0x2eb   : > { %v804_v63 = vadd.f32 %v1105_v62, %v942_v54  ;;  %v798_v0 = vpop.f32.mrb[5].mxu1 }
 0x2ec   : > { %v799_v1 = vadd.f32 %v942_v54, %v798_v0 }
 0x2ed   : > { %863 = vst.msk [vmem:[%s1704_s16 + $0x28] sm:$0xff] %vm857_vm0, %v804_v63 }
 0x2ee   : > { %862 = vst.msk [vmem:[%s1704_s16 + $0x20] sm:$0xff] %vm857_vm0, %v799_v1  ;;  %v1108_v2 = vpop.f32.mrb[6].mxu1 }
 0x2ef   : > { %v814_v3 = vadd.f32 %v1108_v2, %v942_v54  ;;  %v808_v6 = vpop.f32.mrb[7].mxu1 }
 0x2f0   : > { %v809_v7 = vadd.f32 %v942_v54, %v808_v6 }
 0x2f1   : > { %865 = vst.msk [vmem:[%s1704_s16 + $0x38] sm:$0xff] %vm857_vm0, %v814_v3 }
 0x2f2   : > { %864 = vst.msk [vmem:[%s1704_s16 + $0x30] sm:$0xff] %vm857_vm0, %v809_v7  ;;  %v1111_v4 = vpop.f32.mrb[8].mxu1 }
 0x2f3   : > { %v824_v8 = vadd.f32 %v1111_v4, %v942_v54  ;;  %v818_v9 = vpop.f32.mrb[9].mxu1 }
 0x2f4   : > { %v819_v60 = vadd.f32 %v942_v54, %v818_v9 }
 0x2f5   : > { %867 = vst.msk [vmem:[%s1704_s16 + $0x48] sm:$0xff] %vm857_vm0, %v824_v8 }
 0x2f6   : > { %866 = vst.msk [vmem:[%s1704_s16 + $0x40] sm:$0xff] %vm857_vm0, %v819_v60  ;;  %v1114_v10 = vpop.f32.mrb[10].mxu1 }
 0x2f7   : > { %v834_v11 = vadd.f32 %v1114_v10, %v942_v54  ;;  %v828_v12 = vpop.f32.mrb[11].mxu1 }
 0x2f8   : > { %v829_v13 = vadd.f32 %v942_v54, %v828_v12 }
 0x2f9   : > { %869 = vst.msk [vmem:[%s1704_s16 + $0x58] sm:$0xff] %vm857_vm0, %v834_v11 }
 0x2fa   : > { %868 = vst.msk [vmem:[%s1704_s16 + $0x50] sm:$0xff] %vm857_vm0, %v829_v13  ;;  %v1117_v14 = vpop.f32.mrb[12].mxu1 }
 0x2fb   : > { %v844_v15 = vadd.f32 %v1117_v14, %v942_v54  ;;  %v838_v16 = vpop.f32.mrb[13].mxu1 }
 0x2fc   : > { %v839_v17 = vadd.f32 %v942_v54, %v838_v16 }
 0x2fd   : > { %871 = vst.msk [vmem:[%s1704_s16 + $0x68] sm:$0xff] %vm857_vm0, %v844_v15 }
 0x2fe   : > { %870 = vst.msk [vmem:[%s1704_s16 + $0x60] sm:$0xff] %vm857_vm0, %v839_v17  ;;  %v1120_v20 = vpop.f32.mrb[14].mxu1 }
 0x2ff   : > { %v854_v18 = vadd.f32 %v1120_v20, %v942_v54  ;;  %v848_v21 = vpop.f32.mrb[15].mxu1 }
 0x300   : > { %v849_v22 = vadd.f32 %v942_v54, %v848_v21 }
 0x301   : > { %873 = vst.msk [vmem:[%s1704_s16 + $0x78] sm:$0xff] %vm857_vm0, %v854_v18 }
 0x302   : > { %872 = vst.msk [vmem:[%s1704_s16 + $0x70] sm:$0xff] %vm857_vm0, %v849_v22 }
 0x303 PF: > { %s12_s9 = sadd.s32 1, %s1299_s9  }
 0x304   : > { %p9_p4 = scmp.ge.s32.totalorder %s12_s9, 4  }
 0x306   :  { %11 = sbr.rel (!%p9_p4) target bundleno = 1 (0x1), region = 58 }

</bundles_post_ra>
